<compile_context>
chip_gen: v7x
topology: tpu7x:2x2x1
jax: 0.10.0
libtpu: 0.0.40
codegen_flags: <defaults>
</compile_context>

<pallas_src>
import functools

import jax
import jax.numpy as jnp
from jax.experimental import pallas as pl
from jax.experimental.pallas import tpu as pltpu


def _round_up(v, m):
    return (v + m - 1) // m * m


# ---------------------------------------------------------------------------
# Kernel 1: fused global average + max pooling over H*W (HBM streaming).
# x viewed as (N*C, H*W); row tiles are "parallel", HW tiles are the
# "arbitrary" reduction axis; (t_r, 1) accumulators stay VMEM-resident.
# ---------------------------------------------------------------------------
def _pool_kernel(x_ref, avg_ref, max_ref, *, hw_valid, block_hw, inv_hw):
    j = pl.program_id(1)
    x = x_ref[...].astype(jnp.float32)        # native-dtype stream, f32 in-tile

    if hw_valid % block_hw != 0:
        # Mask the out-of-bounds tail of the last HW tile (static Python branch).
        col = jax.lax.broadcasted_iota(jnp.int32, x.shape, 1) + j * block_hw
        valid = col < hw_valid
        x_for_sum = jnp.where(valid, x, 0.0)
        x_for_max = jnp.where(valid, x, -jnp.inf)
    else:
        x_for_sum = x
        x_for_max = x

    part_sum = jnp.sum(x_for_sum, axis=-1, keepdims=True)
    part_max = jnp.max(x_for_max, axis=-1, keepdims=True)

    @pl.when(j == 0)
    def _():
        avg_ref[...] = part_sum
        max_ref[...] = part_max

    @pl.when(j > 0)
    def _():
        avg_ref[...] = avg_ref[...] + part_sum
        max_ref[...] = jnp.maximum(max_ref[...], part_max)

    # Fold the 1/(H*W) averaging into the epilogue (removes a separate XLA op).
    @pl.when(j == pl.num_programs(1) - 1)
    def _():
        avg_ref[...] = avg_ref[...] * inv_hw


# ---------------------------------------------------------------------------
# Kernel 2: shared bottleneck MLP + sigmoid, avg/max stacked on the batch axis
# so fc1 and fc2 each execute once.
# ---------------------------------------------------------------------------
def _mlp_kernel(pooled_ref, w1_ref, w2_ref, o_ref, *, half):
    h = jnp.maximum(
        jnp.dot(pooled_ref[...], w1_ref[...], preferred_element_type=jnp.float32),
        0.0)
    y = jnp.dot(h, w2_ref[...], preferred_element_type=jnp.float32)
    o_ref[...] = jax.nn.sigmoid(y[:half] + y[half:])


def prepare_weights(fc1_weight, fc2_weight):
    """One-time prep: reshape 1x1 conv weights to matmul layout, zero-pad the
    hidden dim to a lane-dense multiple of 128 (exact: padded fc1 columns give
    0 after ReLU and padded fc2 rows are 0)."""
    chid, c = fc1_weight.shape[0], fc1_weight.shape[1]
    chid_pad = _round_up(chid, 128)
    w1m = jnp.zeros((c, chid_pad), jnp.float32).at[:, :chid].set(
        jnp.transpose(fc1_weight.reshape(chid, c)).astype(jnp.float32))
    w2m = jnp.zeros((chid_pad, c), jnp.float32).at[:chid, :].set(
        jnp.transpose(fc2_weight.reshape(c, chid)).astype(jnp.float32))
    return w1m, w2m


@jax.jit
def channel_attention_fwd(x_nchw, w1m, w2m):
    """x_nchw: (N, C, H, W) in its native dtype; w1m/w2m from prepare_weights."""
    n, c, h, w = x_nchw.shape
    hw = h * w
    rows = n * c
    itemsize = jnp.dtype(x_nchw.dtype).itemsize

    # ---- Kernel 1: fused global avg + max pooling over H*W ------------------
    x2d = x_nchw.reshape(rows, hw)            # free contiguous reshape, no copy

    # Sublane alignment: 8 rows for 32-bit, 16 for bf16, 32 for int8.
    sub_align = 8 * max(1, 4 // itemsize)
    if rows <= sub_align:
        t_r = sub_align                        # can't split further
    else:
        # >= 2 row tiles so both v7x TensorCores get work; cap at 512.
        t_r = min(512, _round_up(pl.cdiv(rows, 2), sub_align))

    # Size the HW tile from an 8 MiB-per-tile budget (double-buffered 16 MiB,
    # safe on every generation incl. v7x's 64 MiB VMEM), lane-aligned to 128.
    max_tile_bytes = 8 * 1024 * 1024
    hw_budget = max(128, (max_tile_bytes // (t_r * itemsize)) // 128 * 128)
    t_hw = min(hw_budget, _round_up(hw, 128))

    grid = (pl.cdiv(rows, t_r), pl.cdiv(hw, t_hw))

    avg2d, max2d = pl.pallas_call(
        functools.partial(_pool_kernel, hw_valid=hw, block_hw=t_hw, inv_hw=1.0 / hw),
        out_shape=(jax.ShapeDtypeStruct((rows, 1), jnp.float32),
                   jax.ShapeDtypeStruct((rows, 1), jnp.float32)),
        grid_spec=pltpu.PrefetchScalarGridSpec(
            num_scalar_prefetch=0,
            grid=grid,
            in_specs=[pl.BlockSpec((t_r, t_hw), lambda i, j: (i, j))],
            out_specs=[pl.BlockSpec((t_r, 1), lambda i, j: (i, 0)),
                       pl.BlockSpec((t_r, 1), lambda i, j: (i, 0))],
        ),
        compiler_params=pltpu.CompilerParams(
            dimension_semantics=("parallel", "arbitrary"),
            vmem_limit_bytes=32 * 1024 * 1024),
        cost_estimate=pl.CostEstimate(
            flops=2 * rows * hw, transcendentals=0,
            bytes_accessed=rows * hw * itemsize + 2 * rows * 4),
    )(x2d)

    avg = avg2d.reshape(n, c)                  # already scaled by 1/(H*W)
    mx = max2d.reshape(n, c)

    # ---- Kernel 2: shared bottleneck MLP + sigmoid ---------------------------
    n_pad = _round_up(n, 8)                    # sublane-align tiny batch dim
    pooled = jnp.zeros((2 * n_pad, c), jnp.float32)
    pooled = pooled.at[:n, :].set(avg).at[n_pad:n_pad + n, :].set(mx)

    vmem = pl.BlockSpec(memory_space=pltpu.MemorySpace.VMEM)
    att = pl.pallas_call(
        functools.partial(_mlp_kernel, half=n_pad),
        out_shape=jax.ShapeDtypeStruct((n_pad, c), jnp.float32),
        in_specs=[vmem, vmem, vmem],
        out_specs=vmem,
    )(pooled, w1m, w2m)

    return att[:n].reshape(n, c, 1, 1)         # (N, C, 1, 1), matches PyTorch


def channel_attention(x_nchw, fc1_weight, fc2_weight):
    """Convenience wrapper: fc1_weight (C//16, C, 1, 1), fc2_weight (C, C//16, 1, 1)."""
    w1m, w2m = prepare_weights(fc1_weight, fc2_weight)
    return channel_attention_fwd(x_nchw, w1m, w2m)


def _reference(x, fc1_weight, fc2_weight):
    """Pure-JAX reference matching the PyTorch forward."""
    n, c, h, w = x.shape
    chid = fc1_weight.shape[0]
    avg = jnp.mean(x.astype(jnp.float32), axis=(2, 3))
    mx = jnp.max(x.astype(jnp.float32), axis=(2, 3))
    w1 = fc1_weight.reshape(chid, c).astype(jnp.float32)
    w2 = fc2_weight.reshape(c, chid).astype(jnp.float32)

    def mlp(v):
        return jnp.maximum(v @ w1.T, 0.0) @ w2.T

    y = mlp(avg) + mlp(mx)
    return jax.nn.sigmoid(y).reshape(n, c, 1, 1)


if __name__ == "__main__":
    key = jax.random.PRNGKey(0)
    k_x, k_w1, k_w2 = jax.random.split(key, 3)

    # in_planes must be >= 16 because the module hard-codes in_planes // 16.
    N, C, H, W = 2, 64, 16, 16
    C_HID = C // 16

    x = jax.random.normal(k_x, (N, C, H, W), dtype=jnp.float32)
    fc1_w = jax.random.normal(k_w1, (C_HID, C, 1, 1), dtype=jnp.float32) * 0.1
    fc2_w = jax.random.normal(k_w2, (C, C_HID, 1, 1), dtype=jnp.float32) * 0.1

    # Weight padding hoisted out of the per-call path.
    w1m, w2m = prepare_weights(fc1_w, fc2_w)

    out = channel_attention_fwd(x, w1m, w2m)
    out = jax.block_until_ready(out)

    ref = _reference(x, fc1_w, fc2_w)
    assert out.shape == (N, C, 1, 1)
    assert jnp.allclose(out, ref, rtol=1e-4, atol=1e-5), "mismatch vs reference"

    print("KERNEL_OK")
</pallas_src>

<mosaic_0001>
module attributes {stable_mosaic.version = 11 : i64} {
  func.func @_pool_kernel(%arg0: i32, %arg1: i32, %arg2: memref<64x256xf32, #tpu.memory_space<vmem>>, %arg3: memref<64x1xf32, #tpu.memory_space<vmem>>, %arg4: memref<64x1xf32, #tpu.memory_space<vmem>>) attributes {dimension_semantics = [#tpu.dimension_semantics<parallel>, #tpu.dimension_semantics<arbitrary>], iteration_bounds = array<i64: 2, 1>, scalar_prefetch = 0 : i64, scratch_operands = 0 : i64, tpu.core_type = #tpu.core_type<tc>, window_params = [{transform_indices = @transform_0, window_bounds = array<i64: 64, 256>}, {transform_indices = @transform_1, window_bounds = array<i64: 64, 1>}, {transform_indices = @transform_2, window_bounds = array<i64: 64, 1>}]} {
    %c0 = arith.constant 0 : index
    %c0_0 = arith.constant 0 : index
    %0 = vector.load %arg2[%c0, %c0_0] : memref<64x256xf32, #tpu.memory_space<vmem>>, vector<64x256xf32>
    %cst = arith.constant dense<0.000000e+00> : vector<64xf32>
    %1 = vector.multi_reduction <add>, %0, %cst [1] : vector<64x256xf32> to vector<64xf32>
    %2 = vector.shape_cast %1 : vector<64xf32> to vector<64x1xf32>
    %cst_1 = arith.constant dense<0xFF800000> : vector<64xf32>
    %3 = vector.multi_reduction <maximumf>, %0, %cst_1 [1] : vector<64x256xf32> to vector<64xf32>
    %4 = vector.shape_cast %3 : vector<64xf32> to vector<64x1xf32>
    %c0_i32 = arith.constant 0 : i32
    %5 = arith.cmpi eq, %arg1, %c0_i32 : i32
    %6 = arith.extui %5 : i1 to i32
    %c0_i32_2 = arith.constant 0 : i32
    %7 = arith.cmpi ne, %6, %c0_i32_2 : i32
    scf.if %7 {
      %c0_7 = arith.constant 0 : index
      %c0_8 = arith.constant 0 : index
      %14 = vector.load %arg3[%c0_7, %c0_8] : memref<64x1xf32, #tpu.memory_space<vmem>>, vector<64x1xf32>
      tpu.vector_store %arg3[%c0_7, %c0_8], %2 {strides = array<i32>} : memref<64x1xf32, #tpu.memory_space<vmem>>, vector<64x1xf32>,
      %c0_9 = arith.constant 0 : index
      %c0_10 = arith.constant 0 : index
      %15 = vector.load %arg4[%c0_9, %c0_10] : memref<64x1xf32, #tpu.memory_space<vmem>>, vector<64x1xf32>
      tpu.vector_store %arg4[%c0_9, %c0_10], %4 {strides = array<i32>} : memref<64x1xf32, #tpu.memory_space<vmem>>, vector<64x1xf32>,
    } else {
    }
    %c0_i32_3 = arith.constant 0 : i32
    %8 = arith.cmpi sgt, %arg1, %c0_i32_3 : i32
    %9 = arith.extui %8 : i1 to i32
    %c0_i32_4 = arith.constant 0 : i32
    %10 = arith.cmpi ne, %9, %c0_i32_4 : i32
    scf.if %10 {
      %c0_7 = arith.constant 0 : index
      %c0_8 = arith.constant 0 : index
      %14 = vector.load %arg3[%c0_7, %c0_8] : memref<64x1xf32, #tpu.memory_space<vmem>>, vector<64x1xf32>
      %15 = arith.addf %14, %2 : vector<64x1xf32>
      %c0_9 = arith.constant 0 : index
      %c0_10 = arith.constant 0 : index
      %16 = vector.load %arg3[%c0_9, %c0_10] : memref<64x1xf32, #tpu.memory_space<vmem>>, vector<64x1xf32>
      tpu.vector_store %arg3[%c0_9, %c0_10], %15 {strides = array<i32>} : memref<64x1xf32, #tpu.memory_space<vmem>>, vector<64x1xf32>,
      %c0_11 = arith.constant 0 : index
      %c0_12 = arith.constant 0 : index
      %17 = vector.load %arg4[%c0_11, %c0_12] : memref<64x1xf32, #tpu.memory_space<vmem>>, vector<64x1xf32>
      %18 = arith.maximumf %17, %4 : vector<64x1xf32>
      %c0_13 = arith.constant 0 : index
      %c0_14 = arith.constant 0 : index
      %19 = vector.load %arg4[%c0_13, %c0_14] : memref<64x1xf32, #tpu.memory_space<vmem>>, vector<64x1xf32>
      tpu.vector_store %arg4[%c0_13, %c0_14], %18 {strides = array<i32>} : memref<64x1xf32, #tpu.memory_space<vmem>>, vector<64x1xf32>,
    } else {
    }
    %c0_i32_5 = arith.constant 0 : i32
    %11 = arith.cmpi eq, %arg1, %c0_i32_5 : i32
    %12 = arith.extui %11 : i1 to i32
    %c0_i32_6 = arith.constant 0 : i32
    %13 = arith.cmpi ne, %12, %c0_i32_6 : i32
    scf.if %13 {
      %c0_7 = arith.constant 0 : index
      %c0_8 = arith.constant 0 : index
      %14 = vector.load %arg3[%c0_7, %c0_8] : memref<64x1xf32, #tpu.memory_space<vmem>>, vector<64x1xf32>
      %cst_9 = arith.constant 3.906250e-03 : f32
      %15 = vector.broadcast %cst_9 : f32 to vector<64x1xf32>
      %16 = arith.mulf %14, %15 : vector<64x1xf32>
      %c0_10 = arith.constant 0 : index
      %c0_11 = arith.constant 0 : index
      %17 = vector.load %arg3[%c0_10, %c0_11] : memref<64x1xf32, #tpu.memory_space<vmem>>, vector<64x1xf32>
      tpu.vector_store %arg3[%c0_10, %c0_11], %16 {strides = array<i32>} : memref<64x1xf32, #tpu.memory_space<vmem>>, vector<64x1xf32>,
    } else {
    }
    return
  }
  func.func @transform_0(%arg0: i32, %arg1: i32) -> (i32, i32) {
    %c0_i32 = arith.constant 0 : i32
    return %arg0, %arg1 : i32, i32
  }
  func.func @transform_1(%arg0: i32, %arg1: i32) -> (i32, i32) {
    %c0_i32 = arith.constant 0 : i32
    %c0_i32_0 = arith.constant 0 : i32
    return %arg0, %c0_i32 : i32, i32
  }
  func.func @transform_2(%arg0: i32, %arg1: i32) -> (i32, i32) {
    %c0_i32 = arith.constant 0 : i32
    %c0_i32_0 = arith.constant 0 : i32
    return %arg0, %c0_i32 : i32, i32
  }
}

module attributes {stable_mosaic.version = 11 : i64} {
  func.func @_mlp_kernel(%arg0: memref<16x64xf32, #tpu.memory_space<vmem>>, %arg1: memref<64x128xf32, #tpu.memory_space<vmem>>, %arg2: memref<128x64xf32, #tpu.memory_space<vmem>>, %arg3: memref<8x64xf32, #tpu.memory_space<vmem>>) attributes {dimension_semantics = [], scalar_prefetch = 0 : i64, scratch_operands = 0 : i64, tpu.core_type = #tpu.core_type<tc>} {
    %c0 = arith.constant 0 : index
    %c0_0 = arith.constant 0 : index
    %0 = vector.load %arg0[%c0, %c0_0] : memref<16x64xf32, #tpu.memory_space<vmem>>, vector<16x64xf32>
    %c0_1 = arith.constant 0 : index
    %c0_2 = arith.constant 0 : index
    %1 = vector.load %arg1[%c0_1, %c0_2] : memref<64x128xf32, #tpu.memory_space<vmem>>, vector<64x128xf32>
    %cst = arith.constant dense<0.000000e+00> : vector<16x128xf32>
    %2 = tpu.matmul %0, %1, %cst {dimension_numbers = #tpu.dot_dimension_numbers<[1], [0], [0], [1], [0, 0, 1, 1], [], []>} : vector<16x64xf32>, vector<64x128xf32>, vector<16x128xf32> -> vector<16x128xf32>
    %cst_3 = arith.constant 0.000000e+00 : f32
    %3 = vector.broadcast %cst_3 : f32 to vector<16x128xf32>
    %4 = arith.maximumf %2, %3 : vector<16x128xf32>
    %c0_4 = arith.constant 0 : index
    %c0_5 = arith.constant 0 : index
    %5 = vector.load %arg2[%c0_4, %c0_5] : memref<128x64xf32, #tpu.memory_space<vmem>>, vector<128x64xf32>
    %cst_6 = arith.constant dense<0.000000e+00> : vector<16x64xf32>
    %6 = tpu.matmul %4, %5, %cst_6 {dimension_numbers = #tpu.dot_dimension_numbers<[1], [0], [0], [1], [0, 0, 1, 1], [], []>} : vector<16x128xf32>, vector<128x64xf32>, vector<16x64xf32> -> vector<16x64xf32>
    %7 = vector.extract_strided_slice %6 {offsets = [0, 0], sizes = [8, 64], strides = [1, 1]} : vector<16x64xf32> to vector<8x64xf32>
    %8 = vector.extract_strided_slice %6 {offsets = [8, 0], sizes = [8, 64], strides = [1, 1]} : vector<16x64xf32> to vector<8x64xf32>
    %9 = arith.addf %7, %8 : vector<8x64xf32>
    %10 = arith.negf %9 : vector<8x64xf32>
    %11 = math.exp %10 : vector<8x64xf32>
    %cst_7 = arith.constant 1.000000e+00 : f32
    %12 = vector.broadcast %cst_7 : f32 to vector<8x64xf32>
    %13 = arith.addf %12, %11 : vector<8x64xf32>
    %14 = arith.divf %12, %13 : vector<8x64xf32>
    %c0_8 = arith.constant 0 : index
    %c0_9 = arith.constant 0 : index
    %15 = vector.load %arg3[%c0_8, %c0_9] : memref<8x64xf32, #tpu.memory_space<vmem>>, vector<8x64xf32>
    tpu.vector_store %arg3[%c0_8, %c0_9], %14 {strides = array<i32>} : memref<8x64xf32, #tpu.memory_space<vmem>>, vector<8x64xf32>,
    return
  }
}

</mosaic_0001>

<bundles_post_ra>
// kernel: channel_attention_fwd.2
= control target key start
LH: loop header
LB: loop body
LE: loop exit
PB: predicated region body
PF: predicated region fallthrough
CT: control target
= control target key end

     0   :  { %s541_s9 = smov 0   ;;  %s543_s10 = smov 0   ;;  %s635_s0 = inlined_call_operand.vmem [shape: f32[128,256], index: 0, kind: input, shape index: {}]   ;;  %s636_s1 = inlined_call_operand.vmem [shape: f32[128,1], index: 1, kind: output, shape index: {0}]   ;;  %s637_s2 = inlined_call_operand.vmem [shape: f32[128,1], index: 2, kind: output, shape index: {1}]  }
   0x1   :  { %s545_s11 = smov 0  }
   0x2 LB: > { %s25_s12 = sadd.s32 1, %s520_s10  ;;  %p467_p0 = scmp.ge.s32.totalorder %s524_s11, 1  ;;  %s524_s11 = sphi %s545_s11, %s13_s11   ;;  %s520_s10 = sphi %s543_s10, %s639_s10   ;;  %s516_s9 = sphi %s541_s9, %s638_s9  }
   0x3   : > { %p27_p1 = scmp.ge.s32.totalorder %s25_s12, 2  ;;  %p136_p2 = scmp.lt.s32.totalorder %s524_s11, 3 }
   0x5   : > { %s641_s12 = smov (%p27_p1, %s25_s12), 0  ;;  %p137_p3 = pnand %p467_p0, %p136_p2 }
   0x6   : > { %s468_s13 = sshll.u32 (!%p137_p3), %s516_s9, 3  ;;  %vm260_vm0 = vcmask (!%p137_p3), 7168  }
   0x7   : > { %140 = sbr.rel (%p137_p3) target bundleno = 192 (0xc0), region = 24  ;;  %p170_p4 = scmp.lt.s32.totalorder (!%p137_p3), %s468_s13, 15 }
   0xe   : > { %s643_s13 = smov (!%p170_p4, %s468_s13), 15 }
   0xf   : > { %s477_s14 = sshll.u32 %s643_s13, 4  ;;  %s472_s18 = sshll.u32 %s643_s13, 3 }
  0x10   : > { %s177_s17 = scalar_lea.vmem %s635_s0, %s477_s14  ;;  %s571_s21 = scalar_lea.vmem %s636_s1, %s472_s18 }
  0x11   : > { %v196_v0 = vld [vmem:[%s177_s17 + $0x20] sm:$0xff]  ;;  %v197_v1 = vld [vmem:[%s177_s17 + $0x28] sm:$0xff]  ;;  %v198_v5 = vld [vmem:[%s177_s17 + $0x30] sm:$0xff]  ;;  %s190_s24 = scalar_lea.vmem %s637_s2, %s472_s18 }
  0x12   : > { %v192_v2 = vld [vmem:[%s177_s17] sm:$0xff]  ;;  %v214_v3 = vadd.f32 %v197_v1, %v196_v0  ;;  %v193_v4 = vld [vmem:[%s177_s17 + $0x8] sm:$0xff]  ;;  %v199_v6 = vld [vmem:[%s177_s17 + $0x38] sm:$0xff]  ;;  %v238_v27 = vmax.f32 %v196_v0, %v197_v1 }
  0x13   : > { %v208_v7 = vadd.f32 %v193_v4, %v192_v2  ;;  %v194_v8 = vld [vmem:[%s177_s17 + $0x10] sm:$0xff]  ;;  %v195_v9 = vld [vmem:[%s177_s17 + $0x18] sm:$0xff]  ;;  %v217_v10 = vadd.f32 %v199_v6, %v198_v5  ;;  %v200_v14 = vld [vmem:[%s177_s17 + $0x40] sm:$0xff]  ;;  %v232_v25 = vmax.f32 %v192_v2, %v193_v4  ;;  %v241_v26 = vmax.f32 %v198_v5, %v199_v6 }
  0x14   : > { %215 = vadd.xlane.f32.xlu1 %v214_v3  ;;  %v211_v11 = vadd.f32 %v195_v9, %v194_v8  ;;  %v202_v12 = vld [vmem:[%s177_s17 + $0x50] sm:$0xff]  ;;  %v203_v13 = vld [vmem:[%s177_s17 + $0x58] sm:$0xff]  ;;  %v201_v15 = vld [vmem:[%s177_s17 + $0x48] sm:$0xff]  ;;  %v235_v24 = vmax.f32 %v194_v8, %v195_v9 }
  0x15   : > { %209 = vadd.xlane.f32.xlu0 %v208_v7  ;;  %v223_v16 = vadd.f32 %v203_v13, %v202_v12  ;;  %v220_v17 = vadd.f32 %v201_v15, %v200_v14  ;;  %v206_v18 = vld [vmem:[%s177_s17 + $0x70] sm:$0xff]  ;;  %v207_v19 = vld [vmem:[%s177_s17 + $0x78] sm:$0xff]  ;;  %v204_v20 = vld [vmem:[%s177_s17 + $0x60] sm:$0xff]  ;;  %v247_v28 = vmax.f32 %v202_v12, %v203_v13  ;;  %v244_v29 = vmax.f32 %v200_v14, %v201_v15 }
  0x16   : > { %v205_v21 = vld [vmem:[%s177_s17 + $0x68] sm:$0xff]  ;;  %v229_v22 = vadd.f32 %v207_v19, %v206_v18  ;;  %v253_v30 = vmax.f32 %v206_v18, %v207_v19 }
  0x17   : > { %v226_v23 = vadd.f32 %v205_v21, %v204_v20  ;;  %v250_v31 = vmax.f32 %v204_v20, %v205_v21 }
  0x18   : > { %218 = vadd.xlane.f32.xlu1 %v217_v10 }
  0x19   : > { %212 = vadd.xlane.f32.xlu0 %v211_v11 }
  0x1c   : > { %224 = vadd.xlane.f32.xlu1 %v223_v16 }
  0x1d   : > { %221 = vadd.xlane.f32.xlu0 %v220_v17 }
  0x20   : > { %230 = vadd.xlane.f32.xlu1 %v229_v22 }
  0x21   : > { %227 = vadd.xlane.f32.xlu0 %v226_v23 }
  0x24   : > { %236 = vmax.xlane.f32.xlu1 %v235_v24 }
  0x25   : > { %233 = vmax.xlane.f32.xlu0 %v232_v25 }
  0x28   : > { %242 = vmax.xlane.f32.xlu1 %v241_v26 }
  0x29   : > { %239 = vmax.xlane.f32.xlu0 %v238_v27 }
  0x2c   : > { %248 = vmax.xlane.f32.xlu1 %v247_v28 }
  0x2d   : > { %245 = vmax.xlane.f32.xlu0 %v244_v29 }
  0x30   : > { %254 = vmax.xlane.f32.xlu1 %v253_v30 }
  0x31   : > { %251 = vmax.xlane.f32.xlu0 %v250_v31 }
  0xa1   : > { %v216_v32 = vpop.xlane.xlu1 %215 }
  0xa2   : > { %263 = vst.msk [vmem:[%s571_s21 + $0x10] sm:$0xff] %vm260_vm0, %v216_v32  ;;  %v210_v33 = vpop.xlane.xlu0 %209 }
  0xa3   : > { %261 = vst.msk [vmem:[%s571_s21] sm:$0xff] %vm260_vm0, %v210_v33 }
  0xa5   : > { %v219_v34 = vpop.xlane.xlu1 %218 }
  0xa6   : > { %264 = vst.msk [vmem:[%s571_s21 + $0x18] sm:$0xff] %vm260_vm0, %v219_v34  ;;  %v213_v35 = vpop.xlane.xlu0 %212 }
  0xa7   : > { %262 = vst.msk [vmem:[%s571_s21 + $0x8] sm:$0xff] %vm260_vm0, %v213_v35 }
  0xa9   : > { %v335_v36 = vld [vmem:[%s571_s21 + $0x10] sm:$0xff]  ;;  %v225_v37 = vpop.xlane.xlu1 %224 }
  0xaa   : > { %v343_v38 = vmul.f32 0.00390625, %v335_v36  ;;  %v333_v39 = vld [vmem:[%s571_s21] sm:$0xff]  ;;  %266 = vst.msk [vmem:[%s571_s21 + $0x28] sm:$0xff] %vm260_vm0, %v225_v37  ;;  %v222_v40 = vpop.xlane.xlu0 %221 }
  0xab   : > { %v341_v41 = vmul.f32 0.00390625, %v333_v39  ;;  %265 = vst.msk [vmem:[%s571_s21 + $0x20] sm:$0xff] %vm260_vm0, %v222_v40 }
  0xac   : > { %352 = vst.msk [vmem:[%s571_s21 + $0x10] sm:$0xff] %vm260_vm0, %v343_v38 }
  0xad   : > { %350 = vst.msk [vmem:[%s571_s21] sm:$0xff] %vm260_vm0, %v341_v41  ;;  %v336_v42 = vld [vmem:[%s571_s21 + $0x18] sm:$0xff]  ;;  %v231_v43 = vpop.xlane.xlu1 %230 }
  0xae   : > { %v344_v44 = vmul.f32 0.00390625, %v336_v42  ;;  %v334_v45 = vld [vmem:[%s571_s21 + $0x8] sm:$0xff]  ;;  %268 = vst.msk [vmem:[%s571_s21 + $0x38] sm:$0xff] %vm260_vm0, %v231_v43  ;;  %v228_v46 = vpop.xlane.xlu0 %227 }
  0xaf   : > { %v342_v47 = vmul.f32 0.00390625, %v334_v45  ;;  %267 = vst.msk [vmem:[%s571_s21 + $0x30] sm:$0xff] %vm260_vm0, %v228_v46 }
  0xb0   : > { %353 = vst.msk [vmem:[%s571_s21 + $0x18] sm:$0xff] %vm260_vm0, %v344_v44 }
  0xb1   : > { %351 = vst.msk [vmem:[%s571_s21 + $0x8] sm:$0xff] %vm260_vm0, %v342_v47  ;;  %v338_v48 = vld [vmem:[%s571_s21 + $0x28] sm:$0xff]  ;;  %v237_v49 = vpop.xlane.xlu1 %236 }
  0xb2   : > { %v346_v50 = vmul.f32 0.00390625, %v338_v48  ;;  %v337_v51 = vld [vmem:[%s571_s21 + $0x20] sm:$0xff]  ;;  %270 = vst.msk [vmem:[%s190_s24 + $0x8] sm:$0xff] %vm260_vm0, %v237_v49  ;;  %v234_v52 = vpop.xlane.xlu0 %233 }
  0xb3   : > { %v345_v53 = vmul.f32 0.00390625, %v337_v51  ;;  %269 = vst.msk [vmem:[%s190_s24] sm:$0xff] %vm260_vm0, %v234_v52 }
  0xb4   : > { %355 = vst.msk [vmem:[%s571_s21 + $0x28] sm:$0xff] %vm260_vm0, %v346_v50 }
  0xb5   : > { %354 = vst.msk [vmem:[%s571_s21 + $0x20] sm:$0xff] %vm260_vm0, %v345_v53  ;;  %v340_v54 = vld [vmem:[%s571_s21 + $0x38] sm:$0xff]  ;;  %v243_v55 = vpop.xlane.xlu1 %242 }
  0xb6   : > { %v348_v56 = vmul.f32 0.00390625, %v340_v54  ;;  %v339_v57 = vld [vmem:[%s571_s21 + $0x30] sm:$0xff]  ;;  %272 = vst.msk [vmem:[%s190_s24 + $0x18] sm:$0xff] %vm260_vm0, %v243_v55  ;;  %v240_v58 = vpop.xlane.xlu0 %239 }
  0xb7   : > { %v347_v59 = vmul.f32 0.00390625, %v339_v57  ;;  %271 = vst.msk [vmem:[%s190_s24 + $0x10] sm:$0xff] %vm260_vm0, %v240_v58 }
  0xb8   : > { %357 = vst.msk [vmem:[%s571_s21 + $0x38] sm:$0xff] %vm260_vm0, %v348_v56 }
  0xb9   : > { %356 = vst.msk [vmem:[%s571_s21 + $0x30] sm:$0xff] %vm260_vm0, %v347_v59  ;;  %v249_v60 = vpop.xlane.xlu1 %248 }
  0xba   : > { %274 = vst.msk [vmem:[%s190_s24 + $0x28] sm:$0xff] %vm260_vm0, %v249_v60  ;;  %v246_v61 = vpop.xlane.xlu0 %245 }
  0xbb   : > { %273 = vst.msk [vmem:[%s190_s24 + $0x20] sm:$0xff] %vm260_vm0, %v246_v61 }
  0xbd   : > { %v255_v62 = vpop.xlane.xlu1 %254 }
  0xbe   : > { %276 = vst.msk [vmem:[%s190_s24 + $0x38] sm:$0xff] %vm260_vm0, %v255_v62  ;;  %v252_v63 = vpop.xlane.xlu0 %251 }
  0xbf   : > { %275 = vst.msk [vmem:[%s190_s24 + $0x30] sm:$0xff] %vm260_vm0, %v252_v63 }
  0xc0 PF: > { %s13_s11 = sadd.s32 1, %s524_s11   ;;  %s638_s9 = smov %s520_s10 }
  0xc1   : > { %p10_p5 = scmp.ge.s32.totalorder %s13_s11, 4   ;;  %s639_s10 = smov %s641_s12 }
  0xc3   :  { %12 = sbr.rel (!%p10_p5) target bundleno = 2 (0x2), region = 78 }

// kernel: channel_attention_fwd.3
= control target key start
LH: loop header
LB: loop body
LE: loop exit
PB: predicated region body
PF: predicated region fallthrough
CT: control target
= control target key end

     0   :  { %vm24_vm0 = vcmask 523264   ;;  %s452_s1 = inlined_call_operand.vmem [shape: f32[64,128], index: 1, kind: input, shape index: {}]   ;;  %s453_s0 = inlined_call_operand.vmem [shape: f32[16,64], index: 0, kind: input, shape index: {}]   ;;  %s454_s2 = inlined_call_operand.vmem [shape: f32[128,64], index: 2, kind: input, shape index: {}]   ;;  %s455_s3 = inlined_call_operand.vmem [shape: f32[8,64], index: 3, kind: output, shape index: {}]  }
   0x1   :  { %v16_v0 = vld [vmem:[%s452_s1] sm:$0xff]  ;;  %v17_v1 = vld [vmem:[%s452_s1 + $0x8] sm:$0xff]  ;;  %v18_v2 = vld [vmem:[%s452_s1 + $0x10] sm:$0xff] }
   0x2   :  { %v296_v3 = vpack.c.bf16 %v17_v1, %v16_v0  ;;  %v19_v4 = vld [vmem:[%s452_s1 + $0x18] sm:$0xff]  ;;  %v20_v6 = vld [vmem:[%s452_s1 + $0x20] sm:$0xff]  ;;  %v21_v7 = vld [vmem:[%s452_s1 + $0x28] sm:$0xff] }
   0x3   :  { %v300_v5 = vpack.c.bf16 %v19_v4, %v18_v2  ;;  %v14_v8 = vld [vmem:[%s453_s0] sm:$0xff]  ;;  %v109_v10 = vld [vmem:[%s454_s2 + $0x8] sm:$0xff]  ;;  %v110_v12 = vld [vmem:[%s454_s2 + $0x10] sm:$0xff]  ;;  %v304_v14 = vpack.c.bf16 %v21_v7, %v20_v6 }
   0x4   :  { %297 = vmatprep.subr.bf16.mxu0 %v296_v3  ;;  %258 = vmatprep.mubr.msk.f32.mxu0 %vm24_vm0, %v14_v8  ;;  %v108_v9 = vld [vmem:[%s454_s2] sm:$0xff]  ;;  %v111_v13 = vld [vmem:[%s454_s2 + $0x18] sm:$0xff]  ;;  %v113_v17 = vld [vmem:[%s454_s2 + $0x28] sm:$0xff] }
   0x5   :  { %299 = vmatpush3.bf16.msra.mxu0 %v296_v3  ;;  %v312_v11 = vpack.c.bf16 %v109_v10, %v108_v9  ;;  %v316_v15 = vpack.c.bf16 %v111_v13, %v110_v12  ;;  %v112_v16 = vld [vmem:[%s454_s2 + $0x20] sm:$0xff]  ;;  %v22_v18 = vld [vmem:[%s452_s1 + $0x30] sm:$0xff]  ;;  %v23_v19 = vld [vmem:[%s452_s1 + $0x38] sm:$0xff] }
   0x6   :  { %301 = vmatprep.subr.bf16.mxu0 %v300_v5  ;;  %v320_v20 = vpack.c.bf16 %v113_v17, %v112_v16  ;;  %v308_v21 = vpack.c.bf16 %v23_v19, %v22_v18  ;;  %v114_v22 = vld [vmem:[%s454_s2 + $0x30] sm:$0xff]  ;;  %v115_v23 = vld [vmem:[%s454_s2 + $0x38] sm:$0xff]  ;;  %v116_v25 = vld [vmem:[%s454_s2 + $0x40] sm:$0xff] }
   0x7   :  { %313 = vmatprep.subr.bf16.mxu1 %v312_v11  ;;  %v324_v24 = vpack.c.bf16 %v115_v23, %v114_v22  ;;  %v117_v26 = vld [vmem:[%s454_s2 + $0x48] sm:$0xff]  ;;  %v118_v29 = vld [vmem:[%s454_s2 + $0x50] sm:$0xff]  ;;  %v119_v30 = vld [vmem:[%s454_s2 + $0x58] sm:$0xff] }
   0x8   :  { %315 = vmatpush3.bf16.msra.mxu1 %v312_v11  ;;  %v15_v27 = vld [vmem:[%s453_s0 + $0x8] sm:$0xff]  ;;  %v328_v28 = vpack.c.bf16 %v117_v26, %v116_v25  ;;  %v332_v31 = vpack.c.bf16 %v119_v30, %v118_v29  ;;  %v120_v32 = vld [vmem:[%s454_s2 + $0x60] sm:$0xff]  ;;  %v122_v35 = vld [vmem:[%s454_s2 + $0x70] sm:$0xff] }
   0x9   :  { %303 = vmatpush3.bf16.msra.mxu0 %v300_v5  ;;  %317 = vmatprep.subr.bf16.mxu1 %v316_v15  ;;  %v121_v33 = vld [vmem:[%s454_s2 + $0x68] sm:$0xff]  ;;  %v123_v36 = vld [vmem:[%s454_s2 + $0x78] sm:$0xff] }
   0xa   :  { %305 = vmatprep.subr.bf16.mxu0 %v304_v14  ;;  %v336_v34 = vpack.c.bf16 %v121_v33, %v120_v32  ;;  %v340_v37 = vpack.c.bf16 %v123_v36, %v122_v35 }
   0xc   :  { %319 = vmatpush3.bf16.msra.mxu1 %v316_v15 }
   0xd   :  { %307 = vmatpush3.bf16.msra.mxu0 %v304_v14  ;;  %321 = vmatprep.subr.bf16.mxu1 %v320_v20 }
   0xe   :  { %309 = vmatprep.subr.bf16.mxu0 %v308_v21 }
  0x10   :  { %323 = vmatpush3.bf16.msra.mxu1 %v320_v20 }
  0x11   :  { %311 = vmatpush3.bf16.msra.mxu0 %v308_v21  ;;  %325 = vmatprep.subr.bf16.mxu1 %v324_v24 }
  0x14   :  { %259 = vmatmul.mubr.msk.f32.vlgmr.msra.gmra.mrb[0].mxu0 %vm24_vm0, %v15_v27  ;;  %327 = vmatpush3.bf16.msra.mxu1 %v324_v24 }
  0x15   :  { %329 = vmatprep.subr.bf16.mxu1 %v328_v28 }
  0x18   :  { %331 = vmatpush3.bf16.msra.mxu1 %v328_v28 }
  0x19   :  { %333 = vmatprep.subr.bf16.mxu1 %v332_v31 }
  0x1c   :  { %335 = vmatpush3.bf16.msra.mxu1 %v332_v31 }
  0x1d   :  { %337 = vmatprep.subr.bf16.mxu1 %v336_v34 }
  0x20   :  { %339 = vmatpush3.bf16.msra.mxu1 %v336_v34 }
  0x21   :  { %341 = vmatprep.subr.bf16.mxu1 %v340_v37 }
  0x24   :  { %343 = vmatpush3.bf16.msra.mxu1 %v340_v37 }
  0xe7   :  { %v260_v38 = vpop.f32.mrb[0].mxu0 }
  0xe8   :  { %v97_v39 = vpop.f32.mrb[1].mxu0  ;;  %v107_v41 = vmax.f32 %v260_v38, 0.0 }
  0xe9   :  { %v106_v40 = vmax.f32 %v97_v39, 0.0 }
  0xeb   :  { %293 = vmatprep.mubr.f32.mxu1 %v106_v40 }
  0xec   :  { %294 = vmatmul.mubr.f32.vlgmr.msra.gmra.mrb[0].mxu1 %v107_v41 }
 0x1bf   :  { %v295_v42 = vpop.f32.mrb[0].mxu1 }
 0x1c0   :  { %v190_v43 = vpop.f32.mrb[1].mxu1 }
 0x1c1   :  { %v199_v44 = vadd.f32 %v295_v42, %v190_v43 }
 0x1c3   :  { %v213_v45 = vmul.f32 -1.442695, %v199_v44 }
 0x1c5   :  { %344 = vpow2.f32 %v213_v45 }
 0x1cf   :  { %v345_v46 = vpop.eup %344 }
 0x1d0   :  { %v203_v47 = vadd.f32 1.0, %v345_v46 }
 0x1d2   :  { %346 = vrcp.f32 %v203_v47 }
 0x1dc   :  { %v347_v48 = vpop.eup %346 }
 0x1dd   :  { %206 = vst.msk [vmem:[%s455_s3] sm:$0xff] %vm24_vm0, %v347_v48 }

</bundles_post_ra>
